<compile_context>
chip_gen: v7x
topology: tpu7x:2x2x1
jax: 0.10.0
libtpu: 0.0.40
codegen_flags: <defaults>
</compile_context>

<pallas_src>
import jax
import jax.numpy as jnp
from jax.experimental import pallas as pl
from jax.experimental.pallas import tpu as pltpu

# ----------------------------------------------------------------------------- helpers

_VMEM = pl.BlockSpec(memory_space=pltpu.MemorySpace.VMEM)


def _vmem_specs(n):
    return [pl.BlockSpec(memory_space=pltpu.MemorySpace.VMEM) for _ in range(n)]


def _init(key, shape, scale=0.05):
    return (scale * jax.random.normal(key, shape)).astype(jnp.float32)


def _round_up(x, m):
    return ((x + m - 1) // m) * m


def _pad_cols(x, n):
    pad = n - x.shape[-1]
    return x if pad == 0 else jnp.pad(x, ((0, 0), (0, pad)))


def _pad_rows(x, n):
    pad = n - x.shape[0]
    if pad == 0:
        return x
    return jnp.pad(x, ((0, pad),) + ((0, 0),) * (x.ndim - 1))


# ----------------------------------------------------------------------------- kernels

def _vision_kernel(obs_ref, goal_ref, mask_ref,
                   w_obs_ref, b_obs_ref, w_goal_ref, b_goal_ref,
                   w_fuse_ref, b_fuse_ref, o_ref):
    """obs/goal feature extraction + goal-mask gating + single fused fusion matmul."""
    obs_feat = jnp.dot(obs_ref[...], w_obs_ref[...],
                       preferred_element_type=jnp.float32) + b_obs_ref[...]
    obs_feat = jnp.maximum(obs_feat, 0.0)

    goal_feat = jnp.dot(goal_ref[...], w_goal_ref[...],
                        preferred_element_type=jnp.float32) + b_goal_ref[...]
    goal_feat = jnp.maximum(goal_feat, 0.0)

    # input_goal_mask == 1 -> goal information is masked out (NoMaD goal masking)
    goal_feat = goal_feat * (1.0 - mask_ref[...])

    # Single MXU pass for the fusion stage: [obs_feat | goal_feat] @ concat([wf_obs; wf_goal])
    feat = jnp.concatenate([obs_feat, goal_feat], axis=-1).astype(jnp.bfloat16)
    o_ref[...] = (jnp.dot(feat, w_fuse_ref[...],
                          preferred_element_type=jnp.float32) + b_fuse_ref[...])


def _mlp2_kernel(x_ref, w1_ref, b1_ref, w2_ref, b2_ref, o_ref):
    """Fused 2-layer MLP: relu(X @ W1 + b1) @ W2 + b2 (bf16 MXU operands, f32 accum)."""
    h = jnp.dot(x_ref[...], w1_ref[...], preferred_element_type=jnp.float32) + b1_ref[...]
    h = jnp.maximum(h, 0.0).astype(jnp.bfloat16)
    o_ref[...] = (jnp.dot(h, w2_ref[...],
                          preferred_element_type=jnp.float32) + b2_ref[...])


# ----------------------------------------------------------------------------- modules

class VisionEncoder:
    def __init__(self, key, obs_in_dim, goal_in_dim, enc_dim):
        ks = jax.random.split(key, 4)
        self.enc_dim = enc_dim
        self.enc_pad = _round_up(enc_dim, 128)          # lane-dense output width
        self.w_obs = _init(ks[0], (obs_in_dim, enc_dim)).astype(jnp.bfloat16)
        self.b_obs = jnp.zeros((1, enc_dim), jnp.float32)
        self.w_goal = _init(ks[1], (goal_in_dim, enc_dim)).astype(jnp.bfloat16)
        self.b_goal = jnp.zeros((1, enc_dim), jnp.float32)
        # Pre-concatenated fusion weight: rows = [obs_feat | goal_feat], cols padded to 128.
        wf = jnp.concatenate([_init(ks[2], (enc_dim, enc_dim)),
                              _init(ks[3], (enc_dim, enc_dim))], axis=0)
        self.w_fuse = _pad_cols(wf, self.enc_pad).astype(jnp.bfloat16)
        self.b_fuse = jnp.zeros((1, self.enc_pad), jnp.float32)

    def __call__(self, obs_img, goal_img, input_goal_mask):
        # layout: NCHW images flattened row-major to (B, C*H*W)
        B = obs_img.shape[0]
        B_pad = _round_up(max(B, 8), 8)
        obs_flat = _pad_rows(obs_img.reshape(B, -1), B_pad).astype(jnp.bfloat16)
        goal_flat = _pad_rows(goal_img.reshape(B, -1), B_pad).astype(jnp.bfloat16)
        mask = _pad_rows(input_goal_mask.reshape(B, 1).astype(jnp.float32), B_pad)

        out = pl.pallas_call(
            _vision_kernel,
            out_shape=jax.ShapeDtypeStruct((B_pad, self.enc_pad), jnp.float32),
            in_specs=_vmem_specs(9),
            out_specs=_VMEM,
        )(obs_flat, goal_flat, mask,
          self.w_obs, self.b_obs, self.w_goal, self.b_goal,
          self.w_fuse, self.b_fuse)
        return out[:B, :self.enc_dim]


class NoisePredNet:
    def __init__(self, key, horizon, action_dim, cond_dim, t_emb_dim, hidden_dim):
        ks = jax.random.split(key, 4)
        self.horizon, self.action_dim = horizon, action_dim
        self.t_emb_dim = t_emb_dim
        sample_dim = horizon * action_dim
        self.out_dim = sample_dim
        self.out_pad = _round_up(sample_dim, 128)       # lane-dense output width
        # Pre-concatenated first-layer weight: rows = [sample | t_emb | global_cond]
        w1 = jnp.concatenate([_init(ks[0], (sample_dim, hidden_dim)),
                              _init(ks[1], (t_emb_dim, hidden_dim)),
                              _init(ks[2], (cond_dim, hidden_dim))], axis=0)
        self.w1 = w1.astype(jnp.bfloat16)
        self.b1 = jnp.zeros((1, hidden_dim), jnp.float32)
        self.w2 = _pad_cols(_init(ks[3], (hidden_dim, sample_dim)),
                            self.out_pad).astype(jnp.bfloat16)
        self.b2 = jnp.zeros((1, self.out_pad), jnp.float32)

    @staticmethod
    def _timestep_embedding(t, dim):
        # sinusoidal diffusion-timestep embedding (glue, plain JAX)
        assert dim % 2 == 0, "t_emb_dim must be even"
        half = dim // 2
        freqs = jnp.exp(-jnp.log(10000.0) * jnp.arange(half, dtype=jnp.float32) / half)
        args = t.astype(jnp.float32)[:, None] * freqs[None, :]
        return jnp.concatenate([jnp.sin(args), jnp.cos(args)], axis=-1)

    def __call__(self, sample, timestep, global_cond):
        # TODO(synk): in the real diffusion loop this is invoked N times; a weight-stationary
        # grid over denoising steps would DMA w1/w2 once instead of per call.  The dispatcher
        # semantics here expose only a single step, so a single fused call is used.
        B, T, A = sample.shape
        s_flat = sample.reshape(B, T * A).astype(jnp.float32)
        t = jnp.broadcast_to(jnp.asarray(timestep, jnp.float32).reshape(-1), (B,))
        t_emb = self._timestep_embedding(t, self.t_emb_dim)
        cond = global_cond.astype(jnp.float32)

        x = jnp.concatenate([s_flat, t_emb, cond], axis=-1)   # (B, sample+t_emb+cond)
        B_pad = _round_up(max(B, 8), 8)
        x = _pad_rows(x, B_pad).astype(jnp.bfloat16)

        out = pl.pallas_call(
            _mlp2_kernel,
            out_shape=jax.ShapeDtypeStruct((B_pad, self.out_pad), jnp.float32),
            in_specs=_vmem_specs(5),
            out_specs=_VMEM,
        )(x, self.w1, self.b1, self.w2, self.b2)
        return out[:B, :self.out_dim].reshape(B, T, A)


class DistPredNet:
    def __init__(self, key, in_dim, hidden_dim):
        ks = jax.random.split(key, 2)
        self.out_pad = 128                              # lane-dense output width
        self.w1 = _init(ks[0], (in_dim, hidden_dim)).astype(jnp.bfloat16)
        self.b1 = jnp.zeros((1, hidden_dim), jnp.float32)
        self.w2 = _pad_cols(_init(ks[1], (hidden_dim, 1)), self.out_pad).astype(jnp.bfloat16)
        self.b2 = jnp.zeros((1, self.out_pad), jnp.float32)

    def __call__(self, obsgoal_cond):
        # TODO(synk): could be fused with the vision_encoder kernel to save a launch, but the
        # NoMaD dispatcher exposes it as a separate forward() branch, so semantics are kept.
        B = obsgoal_cond.shape[0]
        B_pad = _round_up(max(B, 8), 8)
        x = _pad_rows(obsgoal_cond.astype(jnp.float32), B_pad).astype(jnp.bfloat16)

        out = pl.pallas_call(
            _mlp2_kernel,
            out_shape=jax.ShapeDtypeStruct((B_pad, self.out_pad), jnp.float32),
            in_specs=_vmem_specs(5),
            out_specs=_VMEM,
        )(x, self.w1, self.b1, self.w2, self.b2)
        return out[:B, :1]


class NoMaD:
    """JAX/Pallas port of the NoMaD dispatcher module."""

    def __init__(self, vision_encoder, noise_pred_net, dist_pred_net):
        self.vision_encoder = vision_encoder
        self.noise_pred_net = noise_pred_net
        self.dist_pred_net = dist_pred_net

    def forward(self, func_name: str, **kwargs):
        if func_name == 'vision_encoder':
            output = self.vision_encoder(kwargs['obs_img'], kwargs['goal_img'],
                                         input_goal_mask=kwargs['input_goal_mask'])
        elif func_name == 'noise_pred_net':
            output = self.noise_pred_net(sample=kwargs['sample'],
                                         timestep=kwargs['timestep'],
                                         global_cond=kwargs['global_cond'])
        elif func_name == 'dist_pred_net':
            output = self.dist_pred_net(kwargs['obsgoal_cond'])
        else:
            raise NotImplementedError
        return output

    __call__ = forward


# ----------------------------------------------------------------------------- main

if __name__ == "__main__":
    # TODO(synk): the real NoMaD sub-networks (EfficientNet-based ViNT encoder,
    # ConditionalUnet1D) are injected externally in the PyTorch code; synthetic fused
    # MLP equivalents are used here since no architecture/checkpoint is provided.
    key = jax.random.PRNGKey(0)
    k_in, k_ve, k_np, k_dp = jax.random.split(key, 4)

    B, C, H, W = 2, 4, 16, 16          # obs/goal images, NCHW
    T, A = 8, 2                        # diffusion action horizon / action dim
    ENC = 64                           # encoding size
    T_EMB, HID_NOISE, HID_DIST = 32, 128, 64

    ks = jax.random.split(k_in, 4)
    obs_img = jax.random.normal(ks[0], (B, C, H, W), jnp.float32)
    goal_img = jax.random.normal(ks[1], (B, C, H, W), jnp.float32)
    input_goal_mask = jnp.array([0, 1], jnp.int32)            # second sample: goal masked
    sample = jax.random.normal(ks[2], (B, T, A), jnp.float32)
    timestep = jnp.array(5, jnp.int32)

    model = NoMaD(
        vision_encoder=VisionEncoder(k_ve, C * H * W, C * H * W, ENC),
        noise_pred_net=NoisePredNet(k_np, T, A, ENC, T_EMB, HID_NOISE),
        dist_pred_net=DistPredNet(k_dp, ENC, HID_DIST),
    )

    obsgoal_cond = model('vision_encoder', obs_img=obs_img, goal_img=goal_img,
                         input_goal_mask=input_goal_mask)
    noise_pred = model('noise_pred_net', sample=sample, timestep=timestep,
                       global_cond=obsgoal_cond)
    dist_pred = model('dist_pred_net', obsgoal_cond=obsgoal_cond)

    jax.block_until_ready((obsgoal_cond, noise_pred, dist_pred))
    assert obsgoal_cond.shape == (B, ENC)
    assert noise_pred.shape == (B, T, A)
    assert dist_pred.shape == (B, 1)
    assert bool(jnp.all(jnp.isfinite(obsgoal_cond)))
    assert bool(jnp.all(jnp.isfinite(noise_pred)))
    assert bool(jnp.all(jnp.isfinite(dist_pred)))
    print("KERNEL_OK")
</pallas_src>

<mosaic_0001>
module attributes {stable_mosaic.version = 11 : i64} {
  func.func @_vision_kernel(%arg0: memref<8x1024xbf16, #tpu.memory_space<vmem>>, %arg1: memref<8x1024xbf16, #tpu.memory_space<vmem>>, %arg2: memref<8x1xf32, #tpu.memory_space<vmem>>, %arg3: memref<1024x64xbf16, #tpu.memory_space<vmem>>, %arg4: memref<1x64xf32, #tpu.memory_space<vmem>>, %arg5: memref<1024x64xbf16, #tpu.memory_space<vmem>>, %arg6: memref<1x64xf32, #tpu.memory_space<vmem>>, %arg7: memref<128x128xbf16, #tpu.memory_space<vmem>>, %arg8: memref<1x128xf32, #tpu.memory_space<vmem>>, %arg9: memref<8x128xf32, #tpu.memory_space<vmem>>) attributes {dimension_semantics = [], scalar_prefetch = 0 : i64, scratch_operands = 0 : i64, tpu.core_type = #tpu.core_type<tc>} {
    %c0 = arith.constant 0 : index
    %c0_0 = arith.constant 0 : index
    %0 = vector.load %arg0[%c0, %c0_0] : memref<8x1024xbf16, #tpu.memory_space<vmem>>, vector<8x1024xbf16>
    %c0_1 = arith.constant 0 : index
    %c0_2 = arith.constant 0 : index
    %1 = vector.load %arg3[%c0_1, %c0_2] : memref<1024x64xbf16, #tpu.memory_space<vmem>>, vector<1024x64xbf16>
    %cst = arith.constant dense<0.000000e+00> : vector<8x64xf32>
    %2 = tpu.matmul %0, %1, %cst {dimension_numbers = #tpu.dot_dimension_numbers<[1], [0], [0], [1], [0, 0, 1, 1], [], []>} : vector<8x1024xbf16>, vector<1024x64xbf16>, vector<8x64xf32> -> vector<8x64xf32>
    %c0_3 = arith.constant 0 : index
    %c0_4 = arith.constant 0 : index
    %3 = vector.load %arg4[%c0_3, %c0_4] : memref<1x64xf32, #tpu.memory_space<vmem>>, vector<1x64xf32>
    %4 = vector.broadcast %3 : vector<1x64xf32> to vector<8x64xf32>
    %5 = arith.addf %2, %4 : vector<8x64xf32>
    %cst_5 = arith.constant 0.000000e+00 : f32
    %6 = vector.broadcast %cst_5 : f32 to vector<8x64xf32>
    %7 = arith.maximumf %5, %6 : vector<8x64xf32>
    %c0_6 = arith.constant 0 : index
    %c0_7 = arith.constant 0 : index
    %8 = vector.load %arg1[%c0_6, %c0_7] : memref<8x1024xbf16, #tpu.memory_space<vmem>>, vector<8x1024xbf16>
    %c0_8 = arith.constant 0 : index
    %c0_9 = arith.constant 0 : index
    %9 = vector.load %arg5[%c0_8, %c0_9] : memref<1024x64xbf16, #tpu.memory_space<vmem>>, vector<1024x64xbf16>
    %cst_10 = arith.constant dense<0.000000e+00> : vector<8x64xf32>
    %10 = tpu.matmul %8, %9, %cst_10 {dimension_numbers = #tpu.dot_dimension_numbers<[1], [0], [0], [1], [0, 0, 1, 1], [], []>} : vector<8x1024xbf16>, vector<1024x64xbf16>, vector<8x64xf32> -> vector<8x64xf32>
    %c0_11 = arith.constant 0 : index
    %c0_12 = arith.constant 0 : index
    %11 = vector.load %arg6[%c0_11, %c0_12] : memref<1x64xf32, #tpu.memory_space<vmem>>, vector<1x64xf32>
    %12 = vector.broadcast %11 : vector<1x64xf32> to vector<8x64xf32>
    %13 = arith.addf %10, %12 : vector<8x64xf32>
    %cst_13 = arith.constant 0.000000e+00 : f32
    %14 = vector.broadcast %cst_13 : f32 to vector<8x64xf32>
    %15 = arith.maximumf %13, %14 : vector<8x64xf32>
    %c0_14 = arith.constant 0 : index
    %c0_15 = arith.constant 0 : index
    %16 = vector.load %arg2[%c0_14, %c0_15] : memref<8x1xf32, #tpu.memory_space<vmem>>, vector<8x1xf32>
    %cst_16 = arith.constant 1.000000e+00 : f32
    %17 = vector.broadcast %cst_16 : f32 to vector<8x1xf32>
    %18 = arith.subf %17, %16 : vector<8x1xf32>
    %19 = vector.broadcast %18 : vector<8x1xf32> to vector<8x64xf32>
    %20 = arith.mulf %15, %19 : vector<8x64xf32>
    %21 = tpu.concatenate %7, %20 in 1 : vector<8x64xf32>, vector<8x64xf32> -> vector<8x128xf32>
    %22 = arith.truncf %21 : vector<8x128xf32> to vector<8x128xbf16>
    %c0_17 = arith.constant 0 : index
    %c0_18 = arith.constant 0 : index
    %23 = vector.load %arg7[%c0_17, %c0_18] : memref<128x128xbf16, #tpu.memory_space<vmem>>, vector<128x128xbf16>
    %cst_19 = arith.constant dense<0.000000e+00> : vector<8x128xf32>
    %24 = tpu.matmul %22, %23, %cst_19 {dimension_numbers = #tpu.dot_dimension_numbers<[1], [0], [0], [1], [0, 0, 1, 1], [], []>} : vector<8x128xbf16>, vector<128x128xbf16>, vector<8x128xf32> -> vector<8x128xf32>
    %c0_20 = arith.constant 0 : index
    %c0_21 = arith.constant 0 : index
    %25 = vector.load %arg8[%c0_20, %c0_21] : memref<1x128xf32, #tpu.memory_space<vmem>>, vector<1x128xf32>
    %26 = vector.broadcast %25 : vector<1x128xf32> to vector<8x128xf32>
    %27 = arith.addf %24, %26 : vector<8x128xf32>
    %c0_22 = arith.constant 0 : index
    %c0_23 = arith.constant 0 : index
    %28 = vector.load %arg9[%c0_22, %c0_23] : memref<8x128xf32, #tpu.memory_space<vmem>>, vector<8x128xf32>
    tpu.vector_store %arg9[%c0_22, %c0_23], %27 {strides = array<i32>} : memref<8x128xf32, #tpu.memory_space<vmem>>, vector<8x128xf32>,
    return
  }
}

</mosaic_0001>

<bundles_post_ra>
// kernel: tpu_custom_call.1
= control target key start
LH: loop header
LB: loop body
LE: loop exit
PB: predicated region body
PF: predicated region fallthrough
CT: control target
= control target key end

     0   :  { %v2141_v9 = vmov 0   ;;  %s2661_s0 = inlined_call_operand.vmem [shape: bf16[8,1024], index: 0, kind: input, shape index: {}]   ;;  %s2662_s1 = inlined_call_operand.vmem [shape: bf16[8,1024], index: 1, kind: input, shape index: {}]   ;;  %s2663_s2 = inlined_call_operand.vmem [shape: f32[8,1], index: 2, kind: input, shape index: {}]   ;;  %s2664_s3 = inlined_call_operand.vmem [shape: bf16[1024,64], index: 3, kind: input, shape index: {}]   ;;  %s2665_s4 = inlined_call_operand.vmem [shape: f32[1,64], index: 4, kind: input, shape index: {}]   ;;  %s2666_s5 = inlined_call_operand.vmem [shape: bf16[1024,64], index: 5, kind: input, shape index: {}]   ;;  %s2667_s6 = inlined_call_operand.vmem [shape: f32[1,64], index: 6, kind: input, shape index: {}]   ;;  %s2668_s7 = inlined_call_operand.vmem [shape: bf16[128,128], index: 7, kind: input, shape index: {}]   ;;  %s2669_s8 = inlined_call_operand.vmem [shape: f32[1,128], index: 8, kind: input, shape index: {}]   ;;  %s2670_s9 = inlined_call_operand.hbm [shape: f32[8,128], index: 9, kind: output, shape index: {}]  }
   0x1   :  { %v1965_v0 = vld [vmem:[%s2664_s3 + $0x40] sm:$0xff]   ;;  %v1969_v4 = vld [vmem:[%s2664_s3 + $0x48] sm:$0xff]   ;;  %v1973_v8 = vld [vmem:[%s2664_s3 + $0x50] sm:$0xff]   ;;  %1964 = vset.pattern.permute.xlu0 %v2141_v9 }
   0x2   :  { %v1966_v1 = vld [vmem:[%s2664_s3 + $0xc0] sm:$0xff]   ;;  %1754 = vmatprep.subr.bf16.mxu0 %v1965_v0  ;;  %v1970_v5 = vld [vmem:[%s2664_s3 + $0xc8] sm:$0xff]   ;;  %v1974_v10 = vld [vmem:[%s2664_s3 + $0xd0] sm:$0xff]  }
   0x3   :  { %v1967_v2 = vld [vmem:[%s2664_s3] sm:$0xff]   ;;  %1776 = vmatprep.subr.bf16.mxu1 %v1966_v1  ;;  %v1971_v6 = vld [vmem:[%s2664_s3 + $0x8] sm:$0xff]   ;;  %v1975_v11 = vld [vmem:[%s2664_s3 + $0x10] sm:$0xff]  }
   0x4   :  { %v1968_v3 = vld [vmem:[%s2664_s3 + $0x80] sm:$0xff]   ;;  %1755 = vmatpush3.bf16.msra.mxu0 %v1967_v2  ;;  %v1972_v7 = vld [vmem:[%s2664_s3 + $0x88] sm:$0xff]   ;;  %v1976_v12 = vld [vmem:[%s2664_s3 + $0x90] sm:$0xff]  }
   0x5   :  { %1777 = vmatpush3.bf16.msra.mxu1 %v1968_v3  ;;  %1756 = vmatprep.subr.bf16.mxu0 %v1969_v4  ;;  %v1977_v13 = vld [vmem:[%s2664_s3 + $0x58] sm:$0xff]   ;;  %v1981_v17 = vld [vmem:[%s2664_s3 + $0x60] sm:$0xff]   ;;  %v1985_v21 = vld [vmem:[%s2664_s3 + $0x68] sm:$0xff]  }
   0x6   :  { %1778 = vmatprep.subr.bf16.mxu1 %v1970_v5  ;;  %v1978_v14 = vld [vmem:[%s2664_s3 + $0xd8] sm:$0xff]   ;;  %v1982_v18 = vld [vmem:[%s2664_s3 + $0xe0] sm:$0xff]   ;;  %v1986_v22 = vld [vmem:[%s2664_s3 + $0xe8] sm:$0xff]  }
   0x7   :  { %v1979_v15 = vld [vmem:[%s2664_s3 + $0x18] sm:$0xff]   ;;  %v1983_v19 = vld [vmem:[%s2664_s3 + $0x20] sm:$0xff]   ;;  %v1987_v23 = vld [vmem:[%s2664_s3 + $0x28] sm:$0xff]  }
   0x8   :  { %1757 = vmatpush3.bf16.msra.mxu0 %v1971_v6  ;;  %v1980_v16 = vld [vmem:[%s2664_s3 + $0x98] sm:$0xff]   ;;  %v1984_v20 = vld [vmem:[%s2664_s3 + $0xa0] sm:$0xff]   ;;  %v1988_v24 = vld [vmem:[%s2664_s3 + $0xa8] sm:$0xff]  }
   0x9   :  { %1779 = vmatpush3.bf16.msra.mxu1 %v1972_v7  ;;  %1758 = vmatprep.subr.bf16.mxu0 %v1973_v8  ;;  %v1989_v25 = vld [vmem:[%s2664_s3 + $0x70] sm:$0xff]   ;;  %v1993_v29 = vld [vmem:[%s2664_s3 + $0x78] sm:$0xff]   ;;  %v34_v33 = vld [vmem:[%s2661_s0] sm:$0xff] }
   0xa   :  { %1780 = vmatprep.subr.bf16.mxu1 %v1974_v10  ;;  %v1990_v26 = vld [vmem:[%s2664_s3 + $0xf0] sm:$0xff]   ;;  %v1994_v30 = vld [vmem:[%s2664_s3 + $0xf8] sm:$0xff]   ;;  %v35_v34 = vld [vmem:[%s2661_s0 + $0x8] sm:$0xff]  ;;  %v1600_v35 = vcombine.low %v34_v33, %v34_v33  ;;  %v1601_v36 = vcombine.high %v34_v33, %v34_v33 }
   0xb   :  { %v1991_v27 = vld [vmem:[%s2664_s3 + $0x30] sm:$0xff]   ;;  %v1995_v31 = vld [vmem:[%s2664_s3 + $0x38] sm:$0xff]   ;;  %v1602_v37 = vcombine.low %v35_v34, %v35_v34  ;;  %v1603_v38 = vcombine.high %v35_v34, %v35_v34  ;;  %v2001_v39 = vld [vmem:[%s2664_s3 + $0x140] sm:$0xff]  }
   0xc   :  { %1759 = vmatpush3.bf16.msra.mxu0 %v1975_v11  ;;  %v1992_v28 = vld [vmem:[%s2664_s3 + $0xb0] sm:$0xff]   ;;  %v1996_v32 = vld [vmem:[%s2664_s3 + $0xb8] sm:$0xff]   ;;  %v2002_v40 = vld [vmem:[%s2664_s3 + $0x1c0] sm:$0xff]   ;;  %617 = vmatprep.mubr.bf16.mxu0 %v1601_v36 }
   0xd   :  { %1781 = vmatpush3.bf16.msra.mxu1 %v1976_v12  ;;  %1760 = vmatprep.subr.bf16.mxu0 %v1977_v13  ;;  %v2003_v41 = vld [vmem:[%s2664_s3 + $0x100] sm:$0xff]   ;;  %v2005_v43 = vld [vmem:[%s2664_s3 + $0x148] sm:$0xff]   ;;  %v2009_v47 = vld [vmem:[%s2664_s3 + $0x150] sm:$0xff]  }
   0xe   :  { %1782 = vmatprep.subr.bf16.mxu1 %v1978_v14  ;;  %657 = vmatprep.mubr.bf16.mxu1 %v1603_v38  ;;  %v2004_v42 = vld [vmem:[%s2664_s3 + $0x180] sm:$0xff]   ;;  %v2006_v44 = vld [vmem:[%s2664_s3 + $0x1c8] sm:$0xff]   ;;  %v2010_v48 = vld [vmem:[%s2664_s3 + $0x1d0] sm:$0xff]  }
   0xf   :  { %v2007_v45 = vld [vmem:[%s2664_s3 + $0x108] sm:$0xff]   ;;  %v2011_v49 = vld [vmem:[%s2664_s3 + $0x110] sm:$0xff]   ;;  %v2013_v51 = vld [vmem:[%s2664_s3 + $0x158] sm:$0xff]  }
  0x10   :  { %1761 = vmatpush3.bf16.msra.mxu0 %v1979_v15  ;;  %v2008_v46 = vld [vmem:[%s2664_s3 + $0x188] sm:$0xff]   ;;  %v2012_v50 = vld [vmem:[%s2664_s3 + $0x190] sm:$0xff]   ;;  %v2014_v52 = vld [vmem:[%s2664_s3 + $0x1d8] sm:$0xff]  }
  0x11   :  { %1783 = vmatpush3.bf16.msra.mxu1 %v1980_v16  ;;  %1762 = vmatprep.subr.bf16.mxu0 %v1981_v17  ;;  %v2015_v53 = vld [vmem:[%s2664_s3 + $0x118] sm:$0xff]   ;;  %v2017_v55 = vld [vmem:[%s2664_s3 + $0x160] sm:$0xff]   ;;  %v2021_v59 = vld [vmem:[%s2664_s3 + $0x168] sm:$0xff]  }
  0x12   :  { %1784 = vmatprep.subr.bf16.mxu1 %v1982_v18  ;;  %v2016_v54 = vld [vmem:[%s2664_s3 + $0x198] sm:$0xff]   ;;  %v2018_v56 = vld [vmem:[%s2664_s3 + $0x1e0] sm:$0xff]   ;;  %v2022_v60 = vld [vmem:[%s2664_s3 + $0x1e8] sm:$0xff]  }
  0x13   :  { %v2019_v57 = vld [vmem:[%s2664_s3 + $0x120] sm:$0xff]   ;;  %v2023_v61 = vld [vmem:[%s2664_s3 + $0x128] sm:$0xff]   ;;  %v2025_v63 = vld [vmem:[%s2664_s3 + $0x170] sm:$0xff]  }
  0x14   :  { %1763 = vmatpush3.bf16.msra.mxu0 %v1983_v19  ;;  %v2020_v58 = vld [vmem:[%s2664_s3 + $0x1a0] sm:$0xff]   ;;  %v2024_v62 = vld [vmem:[%s2664_s3 + $0x1a8] sm:$0xff]   ;;  %v2026_v0 = vld [vmem:[%s2664_s3 + $0x1f0] sm:$0xff]  }
  0x15   :  { %1785 = vmatpush3.bf16.msra.mxu1 %v1984_v20  ;;  %1764 = vmatprep.subr.bf16.mxu0 %v1985_v21  ;;  %v2027_v1 = vld [vmem:[%s2664_s3 + $0x130] sm:$0xff]   ;;  %v2029_v3 = vld [vmem:[%s2664_s3 + $0x178] sm:$0xff]   ;;  %v2037_v13 = vld [vmem:[%s2666_s5 + $0x40] sm:$0xff]  }
  0x16   :  { %1786 = vmatprep.subr.bf16.mxu1 %v1986_v22  ;;  %v2028_v2 = vld [vmem:[%s2664_s3 + $0x1b0] sm:$0xff]   ;;  %v2030_v4 = vld [vmem:[%s2664_s3 + $0x1f8] sm:$0xff]   ;;  %v2038_v14 = vld [vmem:[%s2666_s5 + $0xc0] sm:$0xff]  }
  0x17   :  { %v2031_v5 = vld [vmem:[%s2664_s3 + $0x138] sm:$0xff]   ;;  %v36_v7 = vld [vmem:[%s2661_s0 + $0x10] sm:$0xff]  ;;  %v2039_v15 = vld [vmem:[%s2666_s5] sm:$0xff]  }
  0x18   :  { %1765 = vmatpush3.bf16.msra.mxu0 %v1987_v23  ;;  %v2032_v6 = vld [vmem:[%s2664_s3 + $0x1b8] sm:$0xff]   ;;  %v1604_v8 = vcombine.low %v36_v7, %v36_v7  ;;  %v1605_v9 = vcombine.high %v36_v7, %v36_v7  ;;  %v2040_v16 = vld [vmem:[%s2666_s5 + $0x80] sm:$0xff]   ;;  %v2041_v17 = vld [vmem:[%s2666_s5 + $0x48] sm:$0xff]  }
  0x19   :  { %1787 = vmatpush3.bf16.msra.mxu1 %v1988_v24  ;;  %1766 = vmatprep.subr.bf16.mxu0 %v1989_v25  ;;  %v37_v10 = vld [vmem:[%s2661_s0 + $0x18] sm:$0xff]  ;;  %v2042_v18 = vld [vmem:[%s2666_s5 + $0xc8] sm:$0xff]   ;;  %v2045_v21 = vld [vmem:[%s2666_s5 + $0x50] sm:$0xff]  }
  0x1a   :  { %1788 = vmatprep.subr.bf16.mxu1 %v1990_v26  ;;  %v1606_v11 = vcombine.low %v37_v10, %v37_v10  ;;  %v1607_v12 = vcombine.high %v37_v10, %v37_v10  ;;  %v2043_v19 = vld [vmem:[%s2666_s5 + $0x8] sm:$0xff]   ;;  %v2046_v22 = vld [vmem:[%s2666_s5 + $0xd0] sm:$0xff]   ;;  %v2049_v25 = vld [vmem:[%s2666_s5 + $0x58] sm:$0xff]  }
  0x1b   :  { %v2044_v20 = vld [vmem:[%s2666_s5 + $0x88] sm:$0xff]   ;;  %v2047_v23 = vld [vmem:[%s2666_s5 + $0x10] sm:$0xff]   ;;  %v2050_v26 = vld [vmem:[%s2666_s5 + $0xd8] sm:$0xff]  }
  0x1c   :  { %1767 = vmatpush3.bf16.msra.mxu0 %v1991_v27  ;;  %v2048_v24 = vld [vmem:[%s2666_s5 + $0x90] sm:$0xff]   ;;  %v2051_v27 = vld [vmem:[%s2666_s5 + $0x18] sm:$0xff]   ;;  %v2057_v33 = vld [vmem:[%s2666_s5 + $0x68] sm:$0xff]  }
  0x1d   :  { %1789 = vmatpush3.bf16.msra.mxu1 %v1992_v28  ;;  %1768 = vmatprep.subr.bf16.mxu0 %v1993_v29  ;;  %v2052_v28 = vld [vmem:[%s2666_s5 + $0x98] sm:$0xff]   ;;  %v2053_v29 = vld [vmem:[%s2666_s5 + $0x60] sm:$0xff]   ;;  %v2058_v34 = vld [vmem:[%s2666_s5 + $0xe8] sm:$0xff]  }
  0x1e   :  { %1790 = vmatprep.subr.bf16.mxu1 %v1994_v30  ;;  %v2054_v30 = vld [vmem:[%s2666_s5 + $0xe0] sm:$0xff]   ;;  %v2060_v36 = vld [vmem:[%s2666_s5 + $0xa8] sm:$0xff]   ;;  %v2062_v38 = vld [vmem:[%s2666_s5 + $0xf0] sm:$0xff]  }
  0x1f   :  { %v2093_v7 = vld [vmem:[%s2666_s5 + $0x168] sm:$0xff]  }
  0x20   :  { %1769 = vmatpush3.bf16.msra.mxu0 %v1995_v31  ;;  %v2055_v31 = vld [vmem:[%s2666_s5 + $0x20] sm:$0xff]   ;;  %v2096_v10 = vld [vmem:[%s2666_s5 + $0x1a8] sm:$0xff]  }
  0x21   :  { %1791 = vmatpush3.bf16.msra.mxu1 %v1996_v32  ;;  %1798 = vmatprep.subr.bf16.mxu0 %v2001_v39  ;;  %v2056_v32 = vld [vmem:[%s2666_s5 + $0xa0] sm:$0xff]   ;;  %v2063_v39 = vld [vmem:[%s2666_s5 + $0x30] sm:$0xff]  }
  0x22   :  { %1820 = vmatprep.subr.bf16.mxu1 %v2002_v40  ;;  %v2064_v40 = vld [vmem:[%s2666_s5 + $0xb0] sm:$0xff]  }
  0x23   :  { %618 = vmatmul.mubr.bf16.vlgmr.msra.gmra.mrb[0].mxu0 %v1600_v35  ;;  %v2059_v35 = vld [vmem:[%s2666_s5 + $0x28] sm:$0xff]  }
  0x24   :  { %658 = vmatmul.mubr.bf16.vlgmr.msra.gmra.mrb[0].mxu1 %v1602_v37  ;;  %1799 = vmatpush3.bf16.msra.mxu0 %v2003_v41  ;;  %v2061_v37 = vld [vmem:[%s2666_s5 + $0x70] sm:$0xff]   ;;  %v2065_v41 = vld [vmem:[%s2666_s5 + $0x78] sm:$0xff]  }
  0x25   :  { %1821 = vmatpush3.bf16.msra.mxu1 %v2004_v42  ;;  %1800 = vmatprep.subr.bf16.mxu0 %v2005_v43  ;;  %v2066_v42 = vld [vmem:[%s2666_s5 + $0xf8] sm:$0xff]  }
  0x26   :  { %1822 = vmatprep.subr.bf16.mxu1 %v2006_v44  ;;  %697 = vmatprep.mubr.bf16.mxu0 %v1605_v9  ;;  %v2067_v43 = vld [vmem:[%s2666_s5 + $0x38] sm:$0xff]   ;;  %v2095_v9 = vld [vmem:[%s2666_s5 + $0x128] sm:$0xff]  }
  0x27   :  { %737 = vmatprep.mubr.bf16.mxu1 %v1607_v12  ;;  %v2068_v44 = vld [vmem:[%s2666_s5 + $0xb8] sm:$0xff]   ;;  %v2098_v12 = vld [vmem:[%s2666_s5 + $0x1f0] sm:$0xff]  }
  0x28   :  { %1801 = vmatpush3.bf16.msra.mxu0 %v2007_v45  ;;  %v746_v45 = vld [vmem:[%s2662_s1] sm:$0xff] }
  0x29   :  { %1823 = vmatpush3.bf16.msra.mxu1 %v2008_v46  ;;  %1802 = vmatprep.subr.bf16.mxu0 %v2009_v47  ;;  %v747_v46 = vld [vmem:[%s2662_s1 + $0x8] sm:$0xff]  ;;  %v1673_v47 = vcombine.low %v746_v45, %v746_v45 }
  0x2a   :  { %1824 = vmatprep.subr.bf16.mxu1 %v2010_v48  ;;  %v1674_v48 = vcombine.high %v746_v45, %v746_v45 }
  0x2c   :  { %1803 = vmatpush3.bf16.msra.mxu0 %v2011_v49  ;;  %v1675_v49 = vcombine.low %v747_v46, %v747_v46 }
  0x2d   :  { %1825 = vmatpush3.bf16.msra.mxu1 %v2012_v50  ;;  %1804 = vmatprep.subr.bf16.mxu0 %v2013_v51  ;;  %v1676_v50 = vcombine.high %v747_v46, %v747_v46  ;;  %v2073_v51 = vld [vmem:[%s2666_s5 + $0x140] sm:$0xff]  }
  0x2e   :  { %1826 = vmatprep.subr.bf16.mxu1 %v2014_v52  ;;  %v2074_v52 = vld [vmem:[%s2666_s5 + $0x1c0] sm:$0xff]  }
  0x30   :  { %1805 = vmatpush3.bf16.msra.mxu0 %v2015_v53  ;;  %v2075_v53 = vld [vmem:[%s2666_s5 + $0x100] sm:$0xff]  }
  0x31   :  { %1827 = vmatpush3.bf16.msra.mxu1 %v2016_v54  ;;  %1806 = vmatprep.subr.bf16.mxu0 %v2017_v55  ;;  %v2076_v54 = vld [vmem:[%s2666_s5 + $0x180] sm:$0xff]   ;;  %v2077_v55 = vld [vmem:[%s2666_s5 + $0x148] sm:$0xff]  }
  0x32   :  { %1828 = vmatprep.subr.bf16.mxu1 %v2018_v56  ;;  %v2078_v56 = vld [vmem:[%s2666_s5 + $0x1c8] sm:$0xff]  }
  0x34   :  { %1807 = vmatpush3.bf16.msra.mxu0 %v2019_v57  ;;  %v2079_v57 = vld [vmem:[%s2666_s5 + $0x108] sm:$0xff]  }
  0x35   :  { %1829 = vmatpush3.bf16.msra.mxu1 %v2020_v58  ;;  %1808 = vmatprep.subr.bf16.mxu0 %v2021_v59  ;;  %v2080_v58 = vld [vmem:[%s2666_s5 + $0x188] sm:$0xff]   ;;  %v2081_v59 = vld [vmem:[%s2666_s5 + $0x150] sm:$0xff]  }
  0x36   :  { %1830 = vmatprep.subr.bf16.mxu1 %v2022_v60  ;;  %v2082_v60 = vld [vmem:[%s2666_s5 + $0x1d0] sm:$0xff]  }
  0x38   :  { %1809 = vmatpush3.bf16.msra.mxu0 %v2023_v61  ;;  %v2083_v61 = vld [vmem:[%s2666_s5 + $0x110] sm:$0xff]  }
  0x39   :  { %1831 = vmatpush3.bf16.msra.mxu1 %v2024_v62  ;;  %1810 = vmatprep.subr.bf16.mxu0 %v2025_v63  ;;  %v2084_v62 = vld [vmem:[%s2666_s5 + $0x190] sm:$0xff]   ;;  %v2085_v63 = vld [vmem:[%s2666_s5 + $0x158] sm:$0xff]  }
  0x3a   :  { %1832 = vmatprep.subr.bf16.mxu1 %v2026_v0  ;;  %v2086_v0 = vld [vmem:[%s2666_s5 + $0x1d8] sm:$0xff]  }
  0x3c   :  { %1811 = vmatpush3.bf16.msra.mxu0 %v2027_v1  ;;  %v2087_v1 = vld [vmem:[%s2666_s5 + $0x118] sm:$0xff]  }
  0x3d   :  { %1833 = vmatpush3.bf16.msra.mxu1 %v2028_v2  ;;  %1812 = vmatprep.subr.bf16.mxu0 %v2029_v3  ;;  %v2088_v2 = vld [vmem:[%s2666_s5 + $0x198] sm:$0xff]   ;;  %v2089_v3 = vld [vmem:[%s2666_s5 + $0x160] sm:$0xff]  }
  0x3e   :  { %1834 = vmatprep.subr.bf16.mxu1 %v2030_v4  ;;  %v2090_v4 = vld [vmem:[%s2666_s5 + $0x1e0] sm:$0xff]  }
  0x40   :  { %1813 = vmatpush3.bf16.msra.mxu0 %v2031_v5  ;;  %v2091_v5 = vld [vmem:[%s2666_s5 + $0x120] sm:$0xff]  }
  0x41   :  { %1835 = vmatpush3.bf16.msra.mxu1 %v2032_v6  ;;  %1842 = vmatprep.subr.bf16.mxu0 %v2037_v13  ;;  %v2092_v6 = vld [vmem:[%s2666_s5 + $0x1a0] sm:$0xff]   ;;  %v2099_v13 = vld [vmem:[%s2666_s5 + $0x130] sm:$0xff]  }
  0x42   :  { %1864 = vmatprep.subr.bf16.mxu1 %v2038_v14  ;;  %v2100_v14 = vld [vmem:[%s2666_s5 + $0x1b0] sm:$0xff]  }
  0x43   :  { %698 = vmatmul.mubr.bf16.vlgmr.msra.gmra.mrb[4].mxu0 %v1604_v8  ;;  %v2094_v8 = vld [vmem:[%s2666_s5 + $0x1e8] sm:$0xff]  }
  0x44   :  { %738 = vmatmul.mubr.bf16.vlgmr.msra.gmra.mrb[4].mxu1 %v1606_v11  ;;  %1843 = vmatpush3.bf16.msra.mxu0 %v2039_v15  ;;  %v2097_v11 = vld [vmem:[%s2666_s5 + $0x170] sm:$0xff]   ;;  %v2101_v15 = vld [vmem:[%s2666_s5 + $0x178] sm:$0xff]  }
  0x45   :  { %1865 = vmatpush3.bf16.msra.mxu1 %v2040_v16  ;;  %1844 = vmatprep.subr.bf16.mxu0 %v2041_v17  ;;  %v2102_v16 = vld [vmem:[%s2666_s5 + $0x1f8] sm:$0xff]  }
  0x46   :  { %1866 = vmatprep.subr.bf16.mxu1 %v2042_v18  ;;  %1329 = vmatprep.mubr.bf16.mxu0 %v1674_v48  ;;  %v2103_v17 = vld [vmem:[%s2666_s5 + $0x138] sm:$0xff]  }
  0x47   :  { %1369 = vmatprep.mubr.bf16.mxu1 %v1676_v50  ;;  %v2104_v18 = vld [vmem:[%s2666_s5 + $0x1b8] sm:$0xff]  }
  0x48   :  { %1845 = vmatpush3.bf16.msra.mxu0 %v2043_v19  ;;  %v748_v19 = vld [vmem:[%s2662_s1 + $0x10] sm:$0xff] }
  0x49   :  { %1867 = vmatpush3.bf16.msra.mxu1 %v2044_v20  ;;  %1846 = vmatprep.subr.bf16.mxu0 %v2045_v21  ;;  %v749_v20 = vld [vmem:[%s2662_s1 + $0x18] sm:$0xff]  ;;  %v1458_v21 = vld [vmem:[%s2663_s2] sm:$0xff] }
  0x4a   :  { %1868 = vmatprep.subr.bf16.mxu1 %v2046_v22  ;;  %v1677_v22 = vcombine.low %v748_v19, %v748_v19 }
  0x4c   :  { %1847 = vmatpush3.bf16.msra.mxu0 %v2047_v23  ;;  %v1678_v23 = vcombine.high %v748_v19, %v748_v19 }
  0x4d   :  { %1869 = vmatpush3.bf16.msra.mxu1 %v2048_v24  ;;  %1848 = vmatprep.subr.bf16.mxu0 %v2049_v25  ;;  %v1679_v24 = vcombine.low %v749_v20, %v749_v20  ;;  %v1459_v25 = vsub.f32 1.0, %v1458_v21 }
  0x4e   :  { %1870 = vmatprep.subr.bf16.mxu1 %v2050_v26  ;;  %v1680_v26 = vcombine.high %v749_v20, %v749_v20 }
  0x4f   :  { %1462 = vperm.xlu0 %1964, %v1459_v25  }
  0x50   :  { %1849 = vmatpush3.bf16.msra.mxu0 %v2051_v27 }
  0x51   :  { %1871 = vmatpush3.bf16.msra.mxu1 %v2052_v28  ;;  %1850 = vmatprep.subr.bf16.mxu0 %v2053_v29 }
  0x52   :  { %1872 = vmatprep.subr.bf16.mxu1 %v2054_v30 }
  0x54   :  { %1851 = vmatpush3.bf16.msra.mxu0 %v2055_v31 }
  0x55   :  { %1873 = vmatpush3.bf16.msra.mxu1 %v2056_v32  ;;  %1852 = vmatprep.subr.bf16.mxu0 %v2057_v33 }
  0x56   :  { %1874 = vmatprep.subr.bf16.mxu1 %v2058_v34 }
  0x58   :  { %1853 = vmatpush3.bf16.msra.mxu0 %v2059_v35 }
  0x59   :  { %1875 = vmatpush3.bf16.msra.mxu1 %v2060_v36  ;;  %1854 = vmatprep.subr.bf16.mxu0 %v2061_v37 }
  0x5a   :  { %1876 = vmatprep.subr.bf16.mxu1 %v2062_v38 }
  0x5c   :  { %1855 = vmatpush3.bf16.msra.mxu0 %v2063_v39 }
  0x5d   :  { %1877 = vmatpush3.bf16.msra.mxu1 %v2064_v40  ;;  %1856 = vmatprep.subr.bf16.mxu0 %v2065_v41 }
  0x5e   :  { %1878 = vmatprep.subr.bf16.mxu1 %v2066_v42 }
  0x60   :  { %1857 = vmatpush3.bf16.msra.mxu0 %v2067_v43 }
  0x61   :  { %1879 = vmatpush3.bf16.msra.mxu1 %v2068_v44  ;;  %1886 = vmatprep.subr.bf16.mxu0 %v2073_v51 }
  0x62   :  { %1908 = vmatprep.subr.bf16.mxu1 %v2074_v52 }
  0x63   :  { %1330 = vmatmul.mubr.bf16.vlgmr.msra.gmra.mrb[8].mxu0 %v1673_v47 }
  0x64   :  { %1370 = vmatmul.mubr.bf16.vlgmr.msra.gmra.mrb[8].mxu1 %v1675_v49  ;;  %1887 = vmatpush3.bf16.msra.mxu0 %v2075_v53 }
  0x65   :  { %1909 = vmatpush3.bf16.msra.mxu1 %v2076_v54  ;;  %1888 = vmatprep.subr.bf16.mxu0 %v2077_v55 }
  0x66   :  { %1910 = vmatprep.subr.bf16.mxu1 %v2078_v56  ;;  %1409 = vmatprep.mubr.bf16.mxu0 %v1678_v23 }
  0x67   :  { %1449 = vmatprep.mubr.bf16.mxu1 %v1680_v26 }
  0x68   :  { %1889 = vmatpush3.bf16.msra.mxu0 %v2079_v57 }
  0x69   :  { %1911 = vmatpush3.bf16.msra.mxu1 %v2080_v58  ;;  %1890 = vmatprep.subr.bf16.mxu0 %v2081_v59 }
  0x6a   :  { %1912 = vmatprep.subr.bf16.mxu1 %v2082_v60 }
  0x6c   :  { %1891 = vmatpush3.bf16.msra.mxu0 %v2083_v61 }
  0x6d   :  { %1913 = vmatpush3.bf16.msra.mxu1 %v2084_v62  ;;  %1892 = vmatprep.subr.bf16.mxu0 %v2085_v63 }
  0x6e   :  { %1914 = vmatprep.subr.bf16.mxu1 %v2086_v0 }
  0x70   :  { %1893 = vmatpush3.bf16.msra.mxu0 %v2087_v1 }
  0x71   :  { %1915 = vmatpush3.bf16.msra.mxu1 %v2088_v2  ;;  %1894 = vmatprep.subr.bf16.mxu0 %v2089_v3 }
  0x72   :  { %1916 = vmatprep.subr.bf16.mxu1 %v2090_v4 }
  0x74   :  { %1895 = vmatpush3.bf16.msra.mxu0 %v2091_v5 }
  0x75   :  { %1917 = vmatpush3.bf16.msra.mxu1 %v2092_v6  ;;  %1896 = vmatprep.subr.bf16.mxu0 %v2093_v7 }
  0x76   :  { %1918 = vmatprep.subr.bf16.mxu1 %v2094_v8 }
  0x78   :  { %1897 = vmatpush3.bf16.msra.mxu0 %v2095_v9 }
  0x79   :  { %1919 = vmatpush3.bf16.msra.mxu1 %v2096_v10  ;;  %1898 = vmatprep.subr.bf16.mxu0 %v2097_v11 }
  0x7a   :  { %1920 = vmatprep.subr.bf16.mxu1 %v2098_v12 }
  0x7c   :  { %1899 = vmatpush3.bf16.msra.mxu0 %v2099_v13 }
  0x7d   :  { %1921 = vmatpush3.bf16.msra.mxu1 %v2100_v14  ;;  %1900 = vmatprep.subr.bf16.mxu0 %v2101_v15 }
  0x7e   :  { %1922 = vmatprep.subr.bf16.mxu1 %v2102_v16 }
  0x80   :  { %1901 = vmatpush3.bf16.msra.mxu0 %v2103_v17 }
  0x81   :  { %1923 = vmatpush3.bf16.msra.mxu1 %v2104_v18 }
  0x83   :  { %1410 = vmatmul.mubr.bf16.vlgmr.msra.gmra.mrb[12].mxu0 %v1677_v22 }
  0x84   :  { %1450 = vmatmul.mubr.bf16.vlgmr.msra.gmra.mrb[12].mxu1 %v1679_v24 }
  0x85   :  { %14 = vsyncpa [#allocation3], 0  ;;  %v2109_v27 = vld [vmem:[%s2668_s7] sm:$0xff]   ;;  %v2142_v28 = vmov 0.0   ;;  %v2110_v29 = vld [vmem:[%s2668_s7 + $0x8] sm:$0xff]   ;;  %vm2143_vm0 = vmmov 0  }
  0x86   :  { %1939 = vmatprep.subr.bf16.mxu0 %v2142_v28  ;;  %v2111_v30 = vld [vmem:[%s2668_s7 + $0x10] sm:$0xff]   ;;  %v2112_v31 = vld [vmem:[%s2668_s7 + $0x18] sm:$0xff]   ;;  %v2113_v32 = vld [vmem:[%s2668_s7 + $0x20] sm:$0xff]   ;;  %1955 = vmatprep.mubr.msk.bf16.mxu0 %vm2143_vm0, %v2142_v28  ;;  %vm1470_vm1 = vcmask 523264   ;;  %s2145_s13 = smov [#allocation2]  }
  0x87   :  { %1940 = vmatpush3.bf16.msra.mxu0 %v2109_v27  ;;  %v2114_v35 = vld [vmem:[%s2668_s7 + $0x28] sm:$0xff]   ;;  %v1599_v36 = vld [vmem:[%s2665_s4] ss:$0 sm:$0xff]  ;;  %v2115_v46 = vld [vmem:[%s2668_s7 + $0x30] sm:$0xff]   ;;  %s1591_s14 = sshll.u32 %s2145_s13, 4  ;;  %s1592_s14 = int_to_ptr.vmem [resolvable:$true] %s1591_s14 }
  0x88   :  { %1941 = vmatprep.subr.bf16.mxu0 %v2142_v28  ;;  %v1672_v62 = vld [vmem:[%s2667_s6] ss:$0 sm:$0xff]  ;;  %v2116_v9 = vld [vmem:[%s2668_s7 + $0x38] sm:$0xff]   ;;  %s2144_s6 = smov 64   ;;  %s2117_s15 = scalar_lea.vmem %s1592_s14, 128 }
  0x89   :  { %p2118_p0 = scmp.ne.s32.totalorder %s1592_s14, %s2117_s15  ;;  %p2122_p1 = scmp.lt.s32.totalorder %s1592_s14, %s1592_s14 }
  0x8a   :  { %p2123_p2 = scmp.lt.s32.totalorder %s2117_s15, %s2117_s15 }
  0x8b   :  { %1942 = vmatpush3.bf16.msra.mxu0 %v2110_v29 }
  0x8c   :  { %1943 = vmatprep.subr.bf16.mxu0 %v2142_v28  ;;  %p2124_p3 = por %p2123_p2, %p2122_p1 }
  0x8e   :  { %p2125_p4 = pnand %p2124_p3, %p2118_p0 }
  0x8f   :  { %1944 = vmatpush3.bf16.msra.mxu0 %v2111_v30 }
  0x90   :  { %1945 = vmatprep.subr.bf16.mxu0 %v2142_v28 }
  0x93   :  { %1946 = vmatpush3.bf16.msra.mxu0 %v2112_v31 }
  0x94   :  { %1947 = vmatprep.subr.bf16.mxu0 %v2142_v28 }
  0x97   :  { %1948 = vmatpush3.bf16.msra.mxu0 %v2113_v32 }
  0x98   :  { %1949 = vmatprep.subr.bf16.mxu0 %v2142_v28 }
  0x9b   :  { %1950 = vmatpush3.bf16.msra.mxu0 %v2114_v35 }
  0x9c   :  { %1951 = vmatprep.subr.bf16.mxu0 %v2142_v28 }
  0x9f   :  { %1952 = vmatpush3.bf16.msra.mxu0 %v2115_v46 }
  0xa0   :  { %1953 = vmatprep.subr.bf16.mxu0 %v2142_v28  ;;  %v1745_v28 = vld [vmem:[%s2669_s8] ss:$0 sm:$0xff] }
  0xa3   :  { %1954 = vmatpush3.bf16.msra.mxu0 %v2116_v9 }
  0xce   :  { %v1463_v22 = vpop.permute.xlu0 %1462 }
  0xf6   :  { %v1770_v33 = vpop.f32.mrb[0].mxu0 }
  0xf7   :  { %v1792_v34 = vpop.f32.mrb[0].mxu1  ;;  %v1771_v37 = vpop.f32.mrb[1].mxu0 }
  0xf8   :  { %v1793_v38 = vpop.f32.mrb[1].mxu1  ;;  %v1772_v39 = vadd.f32 %v1771_v37, %v1770_v33  ;;  %v1773_v41 = vpop.f32.mrb[2].mxu0 }
  0xf9   :  { %v1794_v40 = vadd.f32 %v1793_v38, %v1792_v34  ;;  %v1795_v42 = vpop.f32.mrb[2].mxu1  ;;  %v1774_v43 = vpop.f32.mrb[3].mxu0 }
  0xfa   :  { %v1796_v44 = vpop.f32.mrb[3].mxu1  ;;  %v620_v45 = vadd.f32 %v1772_v39, %v1599_v36 }
  0xfc   :  { %v660_v47 = vadd.f32 %v1794_v40, %v620_v45 }
 0x116   :  { %v1814_v48 = vpop.f32.mrb[4].mxu0 }
 0x117   :  { %v1836_v49 = vpop.f32.mrb[4].mxu1  ;;  %v1815_v50 = vpop.f32.mrb[5].mxu0 }
 0x118   :  { %v1837_v51 = vpop.f32.mrb[5].mxu1  ;;  %v1816_v52 = vadd.f32 %v1815_v50, %v1814_v48  ;;  %v1817_v54 = vpop.f32.mrb[6].mxu0 }
 0x119   :  { %v1838_v53 = vadd.f32 %v1837_v51, %v1836_v49  ;;  %v1839_v55 = vpop.f32.mrb[6].mxu1  ;;  %v1818_v56 = vpop.f32.mrb[7].mxu0 }
 0x11a   :  { %v1840_v57 = vpop.f32.mrb[7].mxu1  ;;  %v700_v58 = vadd.f32 %v1816_v52, %v660_v47 }
 0x11c   :  { %v740_v59 = vadd.f32 %v1838_v53, %v700_v58 }
 0x11e   :  { %v745_v25 = vmax.f32 %v740_v59, 0.0 }
 0x136   :  { %v1858_v60 = vpop.f32.mrb[8].mxu0 }
 0x137   :  { %v1880_v61 = vpop.f32.mrb[8].mxu1  ;;  %v1859_v63 = vpop.f32.mrb[9].mxu0 }
 0x138   :  { %v1860_v0 = vadd.f32 %v1859_v63, %v1858_v60  ;;  %v1881_v1 = vpop.f32.mrb[9].mxu1  ;;  %v1861_v2 = vpop.f32.mrb[10].mxu0 }
 0x139   :  { %v1882_v3 = vadd.f32 %v1881_v1, %v1880_v61  ;;  %v1883_v4 = vpop.f32.mrb[10].mxu1  ;;  %v1862_v5 = vpop.f32.mrb[11].mxu0 }
 0x13a   :  { %v1332_v6 = vadd.f32 %v1860_v0, %v1672_v62  ;;  %v1884_v7 = vpop.f32.mrb[11].mxu1 }
 0x13c   :  { %v1372_v8 = vadd.f32 %v1882_v3, %v1332_v6 }
 0x156   :  { %v1902_v10 = vpop.f32.mrb[12].mxu0 }
 0x157   :  { %v1924_v11 = vpop.f32.mrb[12].mxu1  ;;  %v1903_v12 = vpop.f32.mrb[13].mxu0 }
 0x158   :  { %v1904_v13 = vadd.f32 %v1903_v12, %v1902_v10  ;;  %v1925_v14 = vpop.f32.mrb[13].mxu1  ;;  %v1905_v15 = vpop.f32.mrb[14].mxu0 }
 0x159   :  { %v1926_v16 = vadd.f32 %v1925_v14, %v1924_v11  ;;  %v1927_v17 = vpop.f32.mrb[14].mxu1  ;;  %v1906_v18 = vpop.f32.mrb[15].mxu0 }
 0x15a   :  { %v1412_v19 = vadd.f32 %v1904_v13, %v1372_v8  ;;  %v1928_v20 = vpop.f32.mrb[15].mxu1 }
 0x15c   :  { %v1452_v21 = vadd.f32 %v1926_v16, %v1412_v19 }
 0x15e   :  { %v1457_v23 = vmax.f32 %v1452_v21, 0.0 }
 0x160   :  { %v1465_v24 = vmul.f32 %v1463_v22, %v1457_v23 }
 0x162   :  { %1467 = vrot.lane.b32.xlu0 %v1465_v24, %s2144_s6 }
 0x1d4   :  { %v1468_v26 = vpop.permute.xlu0 %1467 }
 0x1d5   :  { %v1471_v27 = vsel %vm1470_vm1, %v745_v25, %v1468_v26 }
 0x1d6   :  { %v1472_v29 = vpack.c.bf16 %v1471_v27, %v1471_v27 }
 0x1d8   :  { %1956 = vmatmul.mubr.bf16.vlgmr.msra.gmra.mrb[16].mxu0 %v1472_v29 }
 0x2ab   :  { %v1578_v30 = vpop.f32.mrb[16].mxu0 }
 0x2ac   :  { %v1579_v31 = vadd.f32 %v1745_v28, %v1578_v30  ;;  %v1957_v32 = vpop.f32.mrb[17].mxu0 }
 0x2ad   :  { %v1581_v33 = vpop.f32.mrb[18].mxu0 }
 0x2ae   :  { %1584 = vst [vmem:[#allocation2] sm:$0xff] %v1579_v31  ;;  %v1958_v34 = vpop.f32.mrb[19].mxu0 }
 0x2af   :  { %2128 = shalt.err (!%p2125_p4)
}
 0x2b0   :  { %s2129_s8 = scalar_lea.hbm %s2670_s9, 128 }
 0x2b1   :  { %p2130_p5 = scmp.ne.s32.totalorder %s2670_s9, %s2129_s8  ;;  %p2133_p6 = scmp.lt.u32.totalorder %s2129_s8, %s2670_s9 }
 0x2b3   :  { %p2135_p7 = pnand %p2133_p6, %p2130_p5 }
 0x2b5   :  { %2138 = shalt.err (!%p2135_p7)
}
 0x2b6   :  { %1594 = dma.vmem_to_hbm [thread:$0]  %s1592_s14, 128, %s2670_s9, [#allocation3]  }
 0x2b7   :  { %2139 = dma.done.wait [#allocation3], 128  }
 0x2b8   :  { %2140 = vsyncadd [#allocation3], 4294967168 }
 0x2b9   :  { %1598 = vsyncpa [#allocation3], 1 }

</bundles_post_ra>
